<compile_context>
chip_gen: v7x
topology: tpu7x:2x2x1
jax: 0.10.0
libtpu: 0.0.40
codegen_flags: <defaults>
</compile_context>

<pallas_src>
import functools

import jax
import jax.numpy as jnp
from jax.experimental import pallas as pl
from jax.experimental.pallas import tpu as pltpu

LANE = 128
SUBLANE = 8


def _round_up(n, m):
    return (n + m - 1) // m * m


def _charrnn_kernel(x_ref, h0_ref, wi_ref, wh_ref, bcat_ref, wy_ref, by_ref,
                    out_ref, hlast_ref, z_ref, *, n_steps, rows_per_step):
    """Whole-sequence CharRNN forward.  All refs are VMEM-resident.

    x_ref    : (T*Bp, p_in)   inputs for all timesteps, flattened over time
    h0_ref   : (Bp, p_h)      initial hidden state
    wi_ref   : (p_in, p_h)    i2h weight (pre-transposed)
    wh_ref   : (p_h, p_h)     h2h weight (pre-transposed)
    bcat_ref : (1, p_h)       bi + bh (pre-combined)
    wy_ref   : (p_h, p_out)   h2y weight (pre-transposed)
    by_ref   : (1, p_out)     h2y bias
    out_ref  : (T*Bp, p_out)  per-step outputs, flattened over time
    hlast_ref: (Bp, p_h)      final hidden state
    z_ref    : (T*Bp, p_h)    scratch: input projections, then hidden states
    """
    w_dtype = wh_ref.dtype

    # (1) Input projection for ALL timesteps in one batched MXU matmul,
    #     with the pre-combined bias (bi + bh) added once.
    z_ref[...] = (
        jnp.dot(x_ref[...], wi_ref[...], preferred_element_type=jnp.float32)
        + bcat_ref[...]
    )

    # (2) Serial recurrence: only the tiny (Bp, p_h)@(p_h, p_h) matmul remains
    #     per step.  n_steps is static -> fully unrolled.
    wh = wh_ref[...]
    h = h0_ref[...].astype(jnp.float32)
    for t in range(n_steps):
        rows = pl.ds(t * rows_per_step, rows_per_step)     # static slice
        pre = z_ref[rows, :] + jnp.dot(h.astype(w_dtype), wh,
                                       preferred_element_type=jnp.float32)
        h = jnp.tanh(pre)               # EUP op on the f32 accumulator
        z_ref[rows, :] = h              # reuse the slot: z now holds h_t

    hlast_ref[...] = h.astype(hlast_ref.dtype)

    # (3) Output projection for ALL timesteps in one matmul + one lane-dense
    #     slab store (no per-step writeback).
    out_ref[...] = (
        jnp.dot(z_ref[...].astype(w_dtype), wy_ref[...],
                preferred_element_type=jnp.float32)
        + by_ref[...]
    ).astype(out_ref.dtype)


def make_char_rnn_forward(params, *, compute_dtype=jnp.float32):
    """Pad the weights ONCE and return a jitted whole-sequence forward.

    params: (wi, bi, wh, bh, wy, by) with weights pre-transposed to
            (in_features, out_features) and biases shaped (1, out_features).
    compute_dtype: dtype fed to the MXU.  float32 matches PyTorch exactly;
            bfloat16 is recommended on v6e/v7x (accumulation stays float32).
    Returns forward_seq(x_seq, h0) -> (outputs (T,B,out), h_final (B,hidden)).
    """
    wi, bi, wh, bh, wy, by = params
    input_size, hidden_size = wi.shape
    output_size = wy.shape[1]

    p_in = _round_up(input_size, LANE)
    p_h = _round_up(hidden_size, LANE)
    p_out = _round_up(output_size, LANE)
    f32 = jnp.float32

    # One-time lane-dense padding (exact zeros -> numerically exact).
    wi_p = jnp.zeros((p_in, p_h), f32).at[:input_size, :hidden_size].set(wi)
    wh_p = jnp.zeros((p_h, p_h), f32).at[:hidden_size, :hidden_size].set(wh)
    wy_p = jnp.zeros((p_h, p_out), f32).at[:hidden_size, :output_size].set(wy)
    bcat = jnp.zeros((1, p_h), f32).at[:, :hidden_size].set(bi + bh)
    by_p = jnp.zeros((1, p_out), f32).at[:, :output_size].set(by)
    wi_p = wi_p.astype(compute_dtype)
    wh_p = wh_p.astype(compute_dtype)
    wy_p = wy_p.astype(compute_dtype)

    @jax.jit
    def forward_seq(x_seq, h0):
        T, B, _ = x_seq.shape
        if T < 1:
            raise ValueError("sequence length must be >= 1")
        Bp = _round_up(B, SUBLANE)

        x_p = (jnp.zeros((T, Bp, p_in), compute_dtype)
               .at[:, :B, :input_size].set(x_seq.astype(compute_dtype))
               .reshape(T * Bp, p_in))
        h0_p = jnp.zeros((Bp, p_h), f32).at[:B, :hidden_size].set(h0)

        kernel = functools.partial(_charrnn_kernel, n_steps=T, rows_per_step=Bp)
        vmem = lambda: pl.BlockSpec(memory_space=pltpu.MemorySpace.VMEM)

        out_p, hlast_p = pl.pallas_call(
            kernel,
            out_shape=(
                jax.ShapeDtypeStruct((T * Bp, p_out), f32),
                jax.ShapeDtypeStruct((Bp, p_h), f32),
            ),
            in_specs=[vmem() for _ in range(7)],
            out_specs=(vmem(), vmem()),
            scratch_shapes=[pltpu.VMEM((T * Bp, p_h), f32)],
        )(x_p, h0_p, wi_p, wh_p, bcat, wy_p, by_p)

        out = out_p.reshape(T, Bp, p_out)[:, :B, :output_size]
        h_last = hlast_p[:B, :hidden_size]
        return out, h_last

    return forward_seq


def char_rnn_step(x, h, params):
    """Single-step API matching the PyTorch module's forward(input, hidden).

    Per the performance review, a T=1 pallas_call is pure fixed overhead for
    ~0.5 MFLOP of work, so this path uses plain XLA matmuls; the Pallas kernel
    above handles whole sequences.
    """
    wi, bi, wh, bh, wy, by = params
    h_new = jnp.tanh(x @ wi + bi + h @ wh + bh)
    return h_new @ wy + by, h_new


def init_linear(key, in_features, out_features):
    """nn.Linear-style init: U(-1/sqrt(fan_in), 1/sqrt(fan_in)).
    Weight returned pre-transposed to (in_features, out_features); bias (1, out)."""
    kw, kb = jax.random.split(key)
    bound = 1.0 / jnp.sqrt(jnp.float32(in_features))
    w = jax.random.uniform(kw, (in_features, out_features), jnp.float32, -bound, bound)
    b = jax.random.uniform(kb, (1, out_features), jnp.float32, -bound, bound)
    return w, b


if __name__ == "__main__":
    # Small shapes consistent with the char-classification RNN.
    seq_len = 12
    batch_size = 8
    input_size = 58      # e.g. n_letters
    hidden_size = 100    # module default
    output_size = 18     # e.g. n_categories

    key = jax.random.PRNGKey(0)
    k_i2h, k_h2h, k_h2y, k_x = jax.random.split(key, 4)

    wi, bi = init_linear(k_i2h, input_size, hidden_size)    # i2h
    wh, bh = init_linear(k_h2h, hidden_size, hidden_size)   # h2h
    wy, by = init_linear(k_h2y, hidden_size, output_size)   # h2y
    params = (wi, bi, wh, bh, wy, by)

    x_seq = jax.random.normal(k_x, (seq_len, batch_size, input_size), jnp.float32)
    h0 = jnp.zeros((batch_size, hidden_size), jnp.float32)  # init_hidden(batch_size)

    forward_seq = make_char_rnn_forward(params)             # weights padded once
    out_seq, h_final = forward_seq(x_seq, h0)
    out_seq = jax.block_until_ready(out_seq)
    h_final = jax.block_until_ready(h_final)

    # Pure-JAX reference: step-by-step, exactly the PyTorch forward semantics.
    h = h0
    ref_outs = []
    for t in range(seq_len):
        h = jnp.tanh(x_seq[t] @ wi + bi + h @ wh + bh)
        ref_outs.append(h @ wy + by)
    ref_out_seq = jnp.stack(ref_outs)

    assert jnp.allclose(out_seq, ref_out_seq, atol=1e-4, rtol=1e-4), "output mismatch"
    assert jnp.allclose(h_final, h, atol=1e-4, rtol=1e-4), "hidden mismatch"

    # Single-step API (module's forward signature) -- plain XLA per review.
    out1, h1 = char_rnn_step(x_seq[0], h0, params)
    out1 = jax.block_until_ready(out1)
    ref_h1 = jnp.tanh(x_seq[0] @ wi + bi + h0 @ wh + bh)
    assert jnp.allclose(out1, ref_h1 @ wy + by, atol=1e-4, rtol=1e-4), "step mismatch"
    assert jnp.allclose(h1, ref_h1, atol=1e-4, rtol=1e-4), "step hidden mismatch"

    print("KERNEL_OK")
</pallas_src>

<mosaic_0001>
module attributes {stable_mosaic.version = 11 : i64} {
  func.func @_charrnn_kernel(%arg0: memref<96x128xf32, #tpu.memory_space<vmem>>, %arg1: memref<8x128xf32, #tpu.memory_space<vmem>>, %arg2: memref<128x128xf32, #tpu.memory_space<vmem>>, %arg3: memref<128x128xf32, #tpu.memory_space<vmem>>, %arg4: memref<1x128xf32, #tpu.memory_space<vmem>>, %arg5: memref<128x128xf32, #tpu.memory_space<vmem>>, %arg6: memref<1x128xf32, #tpu.memory_space<vmem>>, %arg7: memref<96x128xf32, #tpu.memory_space<vmem>>, %arg8: memref<8x128xf32, #tpu.memory_space<vmem>>, %arg9: memref<96x128xf32, #tpu.memory_space<vmem>>) attributes {dimension_semantics = [], scalar_prefetch = 0 : i64, scratch_operands = 1 : i64, tpu.core_type = #tpu.core_type<tc>} {
    %c0 = arith.constant 0 : index
    %c0_0 = arith.constant 0 : index
    %0 = vector.load %arg0[%c0, %c0_0] : memref<96x128xf32, #tpu.memory_space<vmem>>, vector<96x128xf32>
    %c0_1 = arith.constant 0 : index
    %c0_2 = arith.constant 0 : index
    %1 = vector.load %arg2[%c0_1, %c0_2] : memref<128x128xf32, #tpu.memory_space<vmem>>, vector<128x128xf32>
    %cst = arith.constant dense<0.000000e+00> : vector<96x128xf32>
    %2 = tpu.matmul %0, %1, %cst {dimension_numbers = #tpu.dot_dimension_numbers<[1], [0], [0], [1], [0, 0, 1, 1], [], []>} : vector<96x128xf32>, vector<128x128xf32>, vector<96x128xf32> -> vector<96x128xf32>
    %c0_3 = arith.constant 0 : index
    %c0_4 = arith.constant 0 : index
    %3 = vector.load %arg4[%c0_3, %c0_4] : memref<1x128xf32, #tpu.memory_space<vmem>>, vector<1x128xf32>
    %4 = vector.broadcast %3 : vector<1x128xf32> to vector<96x128xf32>
    %5 = arith.addf %2, %4 : vector<96x128xf32>
    %c0_5 = arith.constant 0 : index
    %c0_6 = arith.constant 0 : index
    %6 = vector.load %arg9[%c0_5, %c0_6] : memref<96x128xf32, #tpu.memory_space<vmem>>, vector<96x128xf32>
    tpu.vector_store %arg9[%c0_5, %c0_6], %5 {strides = array<i32>} : memref<96x128xf32, #tpu.memory_space<vmem>>, vector<96x128xf32>,
    %c0_7 = arith.constant 0 : index
    %c0_8 = arith.constant 0 : index
    %7 = vector.load %arg3[%c0_7, %c0_8] : memref<128x128xf32, #tpu.memory_space<vmem>>, vector<128x128xf32>
    %c0_9 = arith.constant 0 : index
    %c0_10 = arith.constant 0 : index
    %8 = vector.load %arg1[%c0_9, %c0_10] : memref<8x128xf32, #tpu.memory_space<vmem>>, vector<8x128xf32>
    %c0_11 = arith.constant 0 : index
    %c0_12 = arith.constant 0 : index
    %9 = vector.load %arg9[%c0_11, %c0_12] : memref<96x128xf32, #tpu.memory_space<vmem>>, vector<8x128xf32>
    %cst_13 = arith.constant dense<0.000000e+00> : vector<8x128xf32>
    %10 = tpu.matmul %8, %7, %cst_13 {dimension_numbers = #tpu.dot_dimension_numbers<[1], [0], [0], [1], [0, 0, 1, 1], [], []>} : vector<8x128xf32>, vector<128x128xf32>, vector<8x128xf32> -> vector<8x128xf32>
    %11 = arith.addf %9, %10 : vector<8x128xf32>
    %12 = math.tanh %11 : vector<8x128xf32>
    %c0_14 = arith.constant 0 : index
    %c0_15 = arith.constant 0 : index
    %13 = vector.load %arg9[%c0_14, %c0_15] : memref<96x128xf32, #tpu.memory_space<vmem>>, vector<8x128xf32>
    tpu.vector_store %arg9[%c0_14, %c0_15], %12 {strides = array<i32>} : memref<96x128xf32, #tpu.memory_space<vmem>>, vector<8x128xf32>,
    %c8 = arith.constant 8 : index
    %c0_16 = arith.constant 0 : index
    %14 = vector.load %arg9[%c8, %c0_16] : memref<96x128xf32, #tpu.memory_space<vmem>>, vector<8x128xf32>
    %cst_17 = arith.constant dense<0.000000e+00> : vector<8x128xf32>
    %15 = tpu.matmul %12, %7, %cst_17 {dimension_numbers = #tpu.dot_dimension_numbers<[1], [0], [0], [1], [0, 0, 1, 1], [], []>} : vector<8x128xf32>, vector<128x128xf32>, vector<8x128xf32> -> vector<8x128xf32>
    %16 = arith.addf %14, %15 : vector<8x128xf32>
    %17 = math.tanh %16 : vector<8x128xf32>
    %c8_18 = arith.constant 8 : index
    %c0_19 = arith.constant 0 : index
    %18 = vector.load %arg9[%c8_18, %c0_19] : memref<96x128xf32, #tpu.memory_space<vmem>>, vector<8x128xf32>
    tpu.vector_store %arg9[%c8_18, %c0_19], %17 {strides = array<i32>} : memref<96x128xf32, #tpu.memory_space<vmem>>, vector<8x128xf32>,
    %c16 = arith.constant 16 : index
    %c0_20 = arith.constant 0 : index
    %19 = vector.load %arg9[%c16, %c0_20] : memref<96x128xf32, #tpu.memory_space<vmem>>, vector<8x128xf32>
    %cst_21 = arith.constant dense<0.000000e+00> : vector<8x128xf32>
    %20 = tpu.matmul %17, %7, %cst_21 {dimension_numbers = #tpu.dot_dimension_numbers<[1], [0], [0], [1], [0, 0, 1, 1], [], []>} : vector<8x128xf32>, vector<128x128xf32>, vector<8x128xf32> -> vector<8x128xf32>
    %21 = arith.addf %19, %20 : vector<8x128xf32>
    %22 = math.tanh %21 : vector<8x128xf32>
    %c16_22 = arith.constant 16 : index
    %c0_23 = arith.constant 0 : index
    %23 = vector.load %arg9[%c16_22, %c0_23] : memref<96x128xf32, #tpu.memory_space<vmem>>, vector<8x128xf32>
    tpu.vector_store %arg9[%c16_22, %c0_23], %22 {strides = array<i32>} : memref<96x128xf32, #tpu.memory_space<vmem>>, vector<8x128xf32>,
    %c24 = arith.constant 24 : index
    %c0_24 = arith.constant 0 : index
    %24 = vector.load %arg9[%c24, %c0_24] : memref<96x128xf32, #tpu.memory_space<vmem>>, vector<8x128xf32>
    %cst_25 = arith.constant dense<0.000000e+00> : vector<8x128xf32>
    %25 = tpu.matmul %22, %7, %cst_25 {dimension_numbers = #tpu.dot_dimension_numbers<[1], [0], [0], [1], [0, 0, 1, 1], [], []>} : vector<8x128xf32>, vector<128x128xf32>, vector<8x128xf32> -> vector<8x128xf32>
    %26 = arith.addf %24, %25 : vector<8x128xf32>
    %27 = math.tanh %26 : vector<8x128xf32>
    %c24_26 = arith.constant 24 : index
    %c0_27 = arith.constant 0 : index
    %28 = vector.load %arg9[%c24_26, %c0_27] : memref<96x128xf32, #tpu.memory_space<vmem>>, vector<8x128xf32>
    tpu.vector_store %arg9[%c24_26, %c0_27], %27 {strides = array<i32>} : memref<96x128xf32, #tpu.memory_space<vmem>>, vector<8x128xf32>,
    %c32 = arith.constant 32 : index
    %c0_28 = arith.constant 0 : index
    %29 = vector.load %arg9[%c32, %c0_28] : memref<96x128xf32, #tpu.memory_space<vmem>>, vector<8x128xf32>
    %cst_29 = arith.constant dense<0.000000e+00> : vector<8x128xf32>
    %30 = tpu.matmul %27, %7, %cst_29 {dimension_numbers = #tpu.dot_dimension_numbers<[1], [0], [0], [1], [0, 0, 1, 1], [], []>} : vector<8x128xf32>, vector<128x128xf32>, vector<8x128xf32> -> vector<8x128xf32>
    %31 = arith.addf %29, %30 : vector<8x128xf32>
    %32 = math.tanh %31 : vector<8x128xf32>
    %c32_30 = arith.constant 32 : index
    %c0_31 = arith.constant 0 : index
    %33 = vector.load %arg9[%c32_30, %c0_31] : memref<96x128xf32, #tpu.memory_space<vmem>>, vector<8x128xf32>
    tpu.vector_store %arg9[%c32_30, %c0_31], %32 {strides = array<i32>} : memref<96x128xf32, #tpu.memory_space<vmem>>, vector<8x128xf32>,
    %c40 = arith.constant 40 : index
    %c0_32 = arith.constant 0 : index
    %34 = vector.load %arg9[%c40, %c0_32] : memref<96x128xf32, #tpu.memory_space<vmem>>, vector<8x128xf32>
    %cst_33 = arith.constant dense<0.000000e+00> : vector<8x128xf32>
    %35 = tpu.matmul %32, %7, %cst_33 {dimension_numbers = #tpu.dot_dimension_numbers<[1], [0], [0], [1], [0, 0, 1, 1], [], []>} : vector<8x128xf32>, vector<128x128xf32>, vector<8x128xf32> -> vector<8x128xf32>
    %36 = arith.addf %34, %35 : vector<8x128xf32>
    %37 = math.tanh %36 : vector<8x128xf32>
    %c40_34 = arith.constant 40 : index
    %c0_35 = arith.constant 0 : index
    %38 = vector.load %arg9[%c40_34, %c0_35] : memref<96x128xf32, #tpu.memory_space<vmem>>, vector<8x128xf32>
    tpu.vector_store %arg9[%c40_34, %c0_35], %37 {strides = array<i32>} : memref<96x128xf32, #tpu.memory_space<vmem>>, vector<8x128xf32>,
    %c48 = arith.constant 48 : index
    %c0_36 = arith.constant 0 : index
    %39 = vector.load %arg9[%c48, %c0_36] : memref<96x128xf32, #tpu.memory_space<vmem>>, vector<8x128xf32>
    %cst_37 = arith.constant dense<0.000000e+00> : vector<8x128xf32>
    %40 = tpu.matmul %37, %7, %cst_37 {dimension_numbers = #tpu.dot_dimension_numbers<[1], [0], [0], [1], [0, 0, 1, 1], [], []>} : vector<8x128xf32>, vector<128x128xf32>, vector<8x128xf32> -> vector<8x128xf32>
    %41 = arith.addf %39, %40 : vector<8x128xf32>
    %42 = math.tanh %41 : vector<8x128xf32>
    %c48_38 = arith.constant 48 : index
    %c0_39 = arith.constant 0 : index
    %43 = vector.load %arg9[%c48_38, %c0_39] : memref<96x128xf32, #tpu.memory_space<vmem>>, vector<8x128xf32>
    tpu.vector_store %arg9[%c48_38, %c0_39], %42 {strides = array<i32>} : memref<96x128xf32, #tpu.memory_space<vmem>>, vector<8x128xf32>,
    %c56 = arith.constant 56 : index
    %c0_40 = arith.constant 0 : index
    %44 = vector.load %arg9[%c56, %c0_40] : memref<96x128xf32, #tpu.memory_space<vmem>>, vector<8x128xf32>
    %cst_41 = arith.constant dense<0.000000e+00> : vector<8x128xf32>
    %45 = tpu.matmul %42, %7, %cst_41 {dimension_numbers = #tpu.dot_dimension_numbers<[1], [0], [0], [1], [0, 0, 1, 1], [], []>} : vector<8x128xf32>, vector<128x128xf32>, vector<8x128xf32> -> vector<8x128xf32>
    %46 = arith.addf %44, %45 : vector<8x128xf32>
    %47 = math.tanh %46 : vector<8x128xf32>
    %c56_42 = arith.constant 56 : index
    %c0_43 = arith.constant 0 : index
    %48 = vector.load %arg9[%c56_42, %c0_43] : memref<96x128xf32, #tpu.memory_space<vmem>>, vector<8x128xf32>
    tpu.vector_store %arg9[%c56_42, %c0_43], %47 {strides = array<i32>} : memref<96x128xf32, #tpu.memory_space<vmem>>, vector<8x128xf32>,
    %c64 = arith.constant 64 : index
    %c0_44 = arith.constant 0 : index
    %49 = vector.load %arg9[%c64, %c0_44] : memref<96x128xf32, #tpu.memory_space<vmem>>, vector<8x128xf32>
    %cst_45 = arith.constant dense<0.000000e+00> : vector<8x128xf32>
    %50 = tpu.matmul %47, %7, %cst_45 {dimension_numbers = #tpu.dot_dimension_numbers<[1], [0], [0], [1], [0, 0, 1, 1], [], []>} : vector<8x128xf32>, vector<128x128xf32>, vector<8x128xf32> -> vector<8x128xf32>
    %51 = arith.addf %49, %50 : vector<8x128xf32>
    %52 = math.tanh %51 : vector<8x128xf32>
    %c64_46 = arith.constant 64 : index
    %c0_47 = arith.constant 0 : index
    %53 = vector.load %arg9[%c64_46, %c0_47] : memref<96x128xf32, #tpu.memory_space<vmem>>, vector<8x128xf32>
    tpu.vector_store %arg9[%c64_46, %c0_47], %52 {strides = array<i32>} : memref<96x128xf32, #tpu.memory_space<vmem>>, vector<8x128xf32>,
    %c72 = arith.constant 72 : index
    %c0_48 = arith.constant 0 : index
    %54 = vector.load %arg9[%c72, %c0_48] : memref<96x128xf32, #tpu.memory_space<vmem>>, vector<8x128xf32>
    %cst_49 = arith.constant dense<0.000000e+00> : vector<8x128xf32>
    %55 = tpu.matmul %52, %7, %cst_49 {dimension_numbers = #tpu.dot_dimension_numbers<[1], [0], [0], [1], [0, 0, 1, 1], [], []>} : vector<8x128xf32>, vector<128x128xf32>, vector<8x128xf32> -> vector<8x128xf32>
    %56 = arith.addf %54, %55 : vector<8x128xf32>
    %57 = math.tanh %56 : vector<8x128xf32>
    %c72_50 = arith.constant 72 : index
    %c0_51 = arith.constant 0 : index
    %58 = vector.load %arg9[%c72_50, %c0_51] : memref<96x128xf32, #tpu.memory_space<vmem>>, vector<8x128xf32>
    tpu.vector_store %arg9[%c72_50, %c0_51], %57 {strides = array<i32>} : memref<96x128xf32, #tpu.memory_space<vmem>>, vector<8x128xf32>,
    %c80 = arith.constant 80 : index
    %c0_52 = arith.constant 0 : index
    %59 = vector.load %arg9[%c80, %c0_52] : memref<96x128xf32, #tpu.memory_space<vmem>>, vector<8x128xf32>
    %cst_53 = arith.constant dense<0.000000e+00> : vector<8x128xf32>
    %60 = tpu.matmul %57, %7, %cst_53 {dimension_numbers = #tpu.dot_dimension_numbers<[1], [0], [0], [1], [0, 0, 1, 1], [], []>} : vector<8x128xf32>, vector<128x128xf32>, vector<8x128xf32> -> vector<8x128xf32>
    %61 = arith.addf %59, %60 : vector<8x128xf32>
    %62 = math.tanh %61 : vector<8x128xf32>
    %c80_54 = arith.constant 80 : index
    %c0_55 = arith.constant 0 : index
    %63 = vector.load %arg9[%c80_54, %c0_55] : memref<96x128xf32, #tpu.memory_space<vmem>>, vector<8x128xf32>
    tpu.vector_store %arg9[%c80_54, %c0_55], %62 {strides = array<i32>} : memref<96x128xf32, #tpu.memory_space<vmem>>, vector<8x128xf32>,
    %c88 = arith.constant 88 : index
    %c0_56 = arith.constant 0 : index
    %64 = vector.load %arg9[%c88, %c0_56] : memref<96x128xf32, #tpu.memory_space<vmem>>, vector<8x128xf32>
    %cst_57 = arith.constant dense<0.000000e+00> : vector<8x128xf32>
    %65 = tpu.matmul %62, %7, %cst_57 {dimension_numbers = #tpu.dot_dimension_numbers<[1], [0], [0], [1], [0, 0, 1, 1], [], []>} : vector<8x128xf32>, vector<128x128xf32>, vector<8x128xf32> -> vector<8x128xf32>
    %66 = arith.addf %64, %65 : vector<8x128xf32>
    %67 = math.tanh %66 : vector<8x128xf32>
    %c88_58 = arith.constant 88 : index
    %c0_59 = arith.constant 0 : index
    %68 = vector.load %arg9[%c88_58, %c0_59] : memref<96x128xf32, #tpu.memory_space<vmem>>, vector<8x128xf32>
    tpu.vector_store %arg9[%c88_58, %c0_59], %67 {strides = array<i32>} : memref<96x128xf32, #tpu.memory_space<vmem>>, vector<8x128xf32>,
    %c0_60 = arith.constant 0 : index
    %c0_61 = arith.constant 0 : index
    %69 = vector.load %arg8[%c0_60, %c0_61] : memref<8x128xf32, #tpu.memory_space<vmem>>, vector<8x128xf32>
    tpu.vector_store %arg8[%c0_60, %c0_61], %67 {strides = array<i32>} : memref<8x128xf32, #tpu.memory_space<vmem>>, vector<8x128xf32>,
    %c0_62 = arith.constant 0 : index
    %c0_63 = arith.constant 0 : index
    %70 = vector.load %arg9[%c0_62, %c0_63] : memref<96x128xf32, #tpu.memory_space<vmem>>, vector<96x128xf32>
    %c0_64 = arith.constant 0 : index
    %c0_65 = arith.constant 0 : index
    %71 = vector.load %arg5[%c0_64, %c0_65] : memref<128x128xf32, #tpu.memory_space<vmem>>, vector<128x128xf32>
    %cst_66 = arith.constant dense<0.000000e+00> : vector<96x128xf32>
    %72 = tpu.matmul %70, %71, %cst_66 {dimension_numbers = #tpu.dot_dimension_numbers<[1], [0], [0], [1], [0, 0, 1, 1], [], []>} : vector<96x128xf32>, vector<128x128xf32>, vector<96x128xf32> -> vector<96x128xf32>
    %c0_67 = arith.constant 0 : index
    %c0_68 = arith.constant 0 : index
    %73 = vector.load %arg6[%c0_67, %c0_68] : memref<1x128xf32, #tpu.memory_space<vmem>>, vector<1x128xf32>
    %74 = vector.broadcast %73 : vector<1x128xf32> to vector<96x128xf32>
    %75 = arith.addf %72, %74 : vector<96x128xf32>
    %c0_69 = arith.constant 0 : index
    %c0_70 = arith.constant 0 : index
    %76 = vector.load %arg7[%c0_69, %c0_70] : memref<96x128xf32, #tpu.memory_space<vmem>>, vector<96x128xf32>
    tpu.vector_store %arg7[%c0_69, %c0_70], %75 {strides = array<i32>} : memref<96x128xf32, #tpu.memory_space<vmem>>, vector<96x128xf32>,
    return
  }
}

</mosaic_0001>

<bundles_post_ra>
// kernel: forward_seq.1
= control target key start
LH: loop header
LB: loop body
LE: loop exit
PB: predicated region body
PF: predicated region fallthrough
CT: control target
= control target key end

     0   :  { %14 = vsyncpa [#allocation4], 0  ;;  %s3116_s0 = inlined_call_operand.vmem [shape: f32[96,128], index: 0, kind: input, shape index: {}]   ;;  %s3117_s1 = inlined_call_operand.vmem [shape: f32[8,128], index: 1, kind: input, shape index: {}]   ;;  %s3118_s2 = inlined_call_operand.hbm [shape: f32[128,128], index: 2, kind: input, shape index: {}]   ;;  %s3119_s3 = inlined_call_operand.hbm [shape: f32[128,128], index: 3, kind: input, shape index: {}]   ;;  %s3120_s4 = inlined_call_operand.vmem [shape: f32[1,128], index: 4, kind: input, shape index: {}]   ;;  %s3121_s5 = inlined_call_operand.vmem [shape: f32[128,128], index: 5, kind: input, shape index: {}]   ;;  %s3122_s6 = inlined_call_operand.vmem [shape: f32[1,128], index: 6, kind: input, shape index: {}]   ;;  %s3123_s7 = inlined_call_operand.hbm [shape: f32[96,128], index: 7, kind: output, shape index: {0}]   ;;  %s3124_s8 = inlined_call_operand.hbm [shape: f32[8,128], index: 8, kind: output, shape index: {1}]  }
   0x1   :  { %15 = vsyncpa [#allocation7], 0 }
   0x2   :  { %16 = vsyncpa [#allocation5], 0 }
   0x3   :  { %17 = vsyncpa [#allocation10], 0  ;;  %s2603_s27 = smov [#allocation3]   ;;  %s2507_s9 = scalar_lea.hbm %s3118_s2, 2048 }
   0x4   :  { %s27_s28 = sshll.u32 %s2603_s27, 4  ;;  %p2508_p0 = scmp.ne.s32.totalorder %s3118_s2, %s2507_s9  ;;  %s28_s28 = int_to_ptr.vmem [resolvable:$true] %s27_s28 }
   0x5   :  { %p2511_p1 = scmp.lt.u32.totalorder %s2507_s9, %s3118_s2 }
   0x7   :  { %p2513_p2 = pnand %p2511_p1, %p2508_p0 }
   0x9   :  { %2516 = shalt.err (!%p2513_p2)
}
   0xa   :  { %s2517_s14 = scalar_lea.vmem %s28_s28, 2048  ;;  %p2522_p4 = scmp.lt.s32.totalorder %s28_s28, %s28_s28 }
   0xb   :  { %p2518_p3 = scmp.ne.s32.totalorder %s28_s28, %s2517_s14  ;;  %p2523_p5 = scmp.lt.s32.totalorder %s2517_s14, %s2517_s14 }
   0xd   :  { %p2524_p6 = por %p2523_p5, %p2522_p4 }
   0xf   :  { %p2525_p7 = pnand %p2524_p6, %p2518_p3 }
  0x11   :  { %2528 = shalt.err (!%p2525_p7)
}
  0x12   :  { %s2604_s15 = smov 128   ;;  %s2605_s16 = smov 8  }
  0x13   :  { %33 = dma.hbm_to_vmem [thread:$0]  %s3118_s2, 2048, %s28_s28, [#allocation4], %s2604_s15, %s2604_s15, %s2605_s16  }
  0x14   :  { %s2606_s19 = smov [#allocation6]   ;;  %s2529_s23 = scalar_lea.hbm %s3119_s3, 2048 }
  0x15   :  { %s39_s20 = sshll.u32 %s2606_s19, 4  ;;  %p2530_p8 = scmp.ne.s32.totalorder %s3119_s3, %s2529_s23  ;;  %s40_s20 = int_to_ptr.vmem [resolvable:$true] %s39_s20 }
  0x16   :  { %p2533_p9 = scmp.lt.u32.totalorder %s2529_s23, %s3119_s3 }
  0x18   :  { %p2535_p10 = pnand %p2533_p9, %p2530_p8 }
  0x1a   :  { %2538 = shalt.err (!%p2535_p10)
}
  0x1b   :  { %s2539_s29 = scalar_lea.vmem %s40_s20, 2048  ;;  %p2544_p12 = scmp.lt.s32.totalorder %s40_s20, %s40_s20 }
  0x1c   :  { %p2540_p11 = scmp.ne.s32.totalorder %s40_s20, %s2539_s29  ;;  %p2545_p13 = scmp.lt.s32.totalorder %s2539_s29, %s2539_s29 }
  0x1e   :  { %p2546_p0 = por %p2545_p13, %p2544_p12 }
  0x20   :  { %p2547_p1 = pnand %p2546_p0, %p2540_p11 }
  0x22   :  { %2550 = shalt.err (!%p2547_p1)
}
  0x23   :  { %45 = dma.hbm_to_vmem [thread:$0]  %s3119_s3, 2048, %s40_s20, [#allocation7], %s2604_s15, %s2604_s15, %s2605_s16  }
  0x24   :  { %2595 = dma.done.wait [#allocation4], 2048  }
  0x25   :  { %2596 = vsyncadd [#allocation4], 4294965248 }
  0x26   :  { %2597 = dma.done.wait [#allocation7], 2048  }
  0x27   :  { %2598 = vsyncadd [#allocation7], 4294965248  ;;  %v2607_v0 = vmov 0.0|0.0   ;;  %vm2608_vm0 = vmmov 0   ;;  %v2609_v1 = vmov 0.0   ;;  %v70_v2 = vld [vmem:[#allocation3] sm:$0xff] }
  0x28   :  { %2154 = vmatprep.subr.bf16.mxu1 %v2607_v0  ;;  %1684 = vmatprep.mubr.msk.f32.mxu1 %vm2608_vm0, %v2609_v1  ;;  %v71_v3 = vld [vmem:[#allocation3 + $0x8] sm:$0xff]  ;;  %v230_v4 = vld [vmem:[#allocation6] sm:$0xff]  ;;  %v72_v7 = vld [vmem:[#allocation3 + $0x10] sm:$0xff] }
  0x29   :  { %v2122_v5 = vpack.c.bf16 %v71_v3, %v70_v2  ;;  %v231_v6 = vld [vmem:[#allocation6 + $0x8] sm:$0xff]  ;;  %v73_v8 = vld [vmem:[#allocation3 + $0x18] sm:$0xff]  ;;  %v232_v11 = vld [vmem:[#allocation6 + $0x10] sm:$0xff] }
  0x2a   :  { %v2690_v9 = vpack.c.bf16 %v231_v6, %v230_v4  ;;  %v2126_v10 = vpack.c.bf16 %v73_v8, %v72_v7  ;;  %v233_v12 = vld [vmem:[#allocation6 + $0x18] sm:$0xff]  ;;  %v74_v13 = vld [vmem:[#allocation3 + $0x20] sm:$0xff]  ;;  %v75_v14 = vld [vmem:[#allocation3 + $0x28] sm:$0xff] }
  0x2b   :  { %2123 = vmatprep.subr.bf16.mxu0 %v2122_v5  ;;  %v2693_v15 = vpack.c.bf16 %v233_v12, %v232_v11  ;;  %v2130_v16 = vpack.c.bf16 %v75_v14, %v74_v13  ;;  %v234_v17 = vld [vmem:[#allocation6 + $0x20] sm:$0xff]  ;;  %v235_v18 = vld [vmem:[#allocation6 + $0x28] sm:$0xff]  ;;  %v76_v19 = vld [vmem:[#allocation3 + $0x30] sm:$0xff] }
  0x2c   :  { %2125 = vmatpush3.bf16.msra.mxu0 %v2122_v5  ;;  %2156 = vmatpush3.bf16.msra.mxu1 %v2690_v9  ;;  %v77_v20 = vld [vmem:[#allocation3 + $0x38] sm:$0xff]  ;;  %v2697_v21 = vpack.c.bf16 %v235_v18, %v234_v17  ;;  %v236_v23 = vld [vmem:[#allocation6 + $0x30] sm:$0xff]  ;;  %v78_v25 = vld [vmem:[#allocation3 + $0x40] sm:$0xff] }
  0x2d   :  { %2127 = vmatprep.subr.bf16.mxu0 %v2126_v10  ;;  %2157 = vmatprep.subr.bf16.mxu1 %v2607_v0  ;;  %v2134_v22 = vpack.c.bf16 %v77_v20, %v76_v19  ;;  %v237_v24 = vld [vmem:[#allocation6 + $0x38] sm:$0xff]  ;;  %v79_v26 = vld [vmem:[#allocation3 + $0x48] sm:$0xff]  ;;  %v58_v27 = vld [vmem:[%s3116_s0] sm:$0xff] }
  0x2e   :  { %1634 = vmatprep.mubr.f32.mxu0 %v58_v27  ;;  %v2704_v28 = vpack.c.bf16 %v237_v24, %v236_v23  ;;  %v2138_v29 = vpack.c.bf16 %v79_v26, %v78_v25  ;;  %v238_v30 = vld [vmem:[#allocation6 + $0x40] sm:$0xff]  ;;  %v239_v31 = vld [vmem:[#allocation6 + $0x48] sm:$0xff]  ;;  %v80_v32 = vld [vmem:[#allocation3 + $0x50] sm:$0xff] }
  0x2f   :  { %v81_v33 = vld [vmem:[#allocation3 + $0x58] sm:$0xff]  ;;  %v2708_v34 = vpack.c.bf16 %v239_v31, %v238_v30  ;;  %v240_v36 = vld [vmem:[#allocation6 + $0x50] sm:$0xff]  ;;  %v82_v38 = vld [vmem:[#allocation3 + $0x60] sm:$0xff] }
  0x30   :  { %2129 = vmatpush3.bf16.msra.mxu0 %v2126_v10  ;;  %2159 = vmatpush3.bf16.msra.mxu1 %v2693_v15  ;;  %v2142_v35 = vpack.c.bf16 %v81_v33, %v80_v32  ;;  %v241_v37 = vld [vmem:[#allocation6 + $0x58] sm:$0xff]  ;;  %v83_v39 = vld [vmem:[#allocation3 + $0x68] sm:$0xff]  ;;  %v242_v42 = vld [vmem:[#allocation6 + $0x60] sm:$0xff] }
  0x31   :  { %2131 = vmatprep.subr.bf16.mxu0 %v2130_v16  ;;  %2160 = vmatprep.subr.bf16.mxu1 %v2607_v0  ;;  %v2712_v40 = vpack.c.bf16 %v241_v37, %v240_v36  ;;  %v2146_v41 = vpack.c.bf16 %v83_v39, %v82_v38  ;;  %v243_v43 = vld [vmem:[#allocation6 + $0x68] sm:$0xff]  ;;  %v84_v44 = vld [vmem:[#allocation3 + $0x70] sm:$0xff]  ;;  %v85_v45 = vld [vmem:[#allocation3 + $0x78] sm:$0xff] }
  0x32   :  { %v2716_v46 = vpack.c.bf16 %v243_v43, %v242_v42  ;;  %v2150_v47 = vpack.c.bf16 %v85_v45, %v84_v44  ;;  %v244_v48 = vld [vmem:[#allocation6 + $0x70] sm:$0xff]  ;;  %v245_v49 = vld [vmem:[#allocation6 + $0x78] sm:$0xff]  ;;  %v59_v51 = vld [vmem:[%s3116_s0 + $0x8] sm:$0xff] }
  0x33   :  { %v2720_v50 = vpack.c.bf16 %v245_v49, %v244_v48  ;;  %v246_v52 = vld [vmem:[%s3117_s1] sm:$0xff]  ;;  %v60_v53 = vld [vmem:[%s3116_s0 + $0x10] sm:$0xff]  ;;  %v61_v54 = vld [vmem:[%s3116_s0 + $0x18] sm:$0xff] }
  0x34   :  { %2133 = vmatpush3.bf16.msra.mxu0 %v2130_v16  ;;  %2162 = vmatpush3.bf16.msra.mxu1 %v2697_v21  ;;  %v62_v55 = vld [vmem:[%s3116_s0 + $0x20] sm:$0xff]  ;;  %v63_v56 = vld [vmem:[%s3116_s0 + $0x28] sm:$0xff]  ;;  %v64_v57 = vld [vmem:[%s3116_s0 + $0x30] sm:$0xff] }
  0x35   :  { %2135 = vmatprep.subr.bf16.mxu0 %v2134_v22  ;;  %2163 = vmatprep.subr.bf16.mxu1 %v2607_v0  ;;  %v65_v58 = vld [vmem:[%s3116_s0 + $0x38] sm:$0xff]  ;;  %v66_v59 = vld [vmem:[%s3116_s0 + $0x40] sm:$0xff]  ;;  %v67_v60 = vld [vmem:[%s3116_s0 + $0x48] sm:$0xff] }
  0x36   :  { %v68_v61 = vld [vmem:[%s3116_s0 + $0x50] sm:$0xff]  ;;  %v69_v62 = vld [vmem:[%s3116_s0 + $0x58] sm:$0xff]  ;;  %v2801_v63 = vld [vmem:[%s3120_s4] ss:$0 sm:$0xff] }
  0x38   :  { %2137 = vmatpush3.bf16.msra.mxu0 %v2134_v22  ;;  %2165 = vmatpush3.bf16.msra.mxu1 %v2704_v28 }
  0x39   :  { %2139 = vmatprep.subr.bf16.mxu0 %v2138_v29  ;;  %2166 = vmatprep.subr.bf16.mxu1 %v2607_v0 }
  0x3c   :  { %2141 = vmatpush3.bf16.msra.mxu0 %v2138_v29  ;;  %2168 = vmatpush3.bf16.msra.mxu1 %v2708_v34 }
  0x3d   :  { %2143 = vmatprep.subr.bf16.mxu0 %v2142_v35  ;;  %2169 = vmatprep.subr.bf16.mxu1 %v2607_v0 }
  0x40   :  { %2145 = vmatpush3.bf16.msra.mxu0 %v2142_v35  ;;  %2171 = vmatpush3.bf16.msra.mxu1 %v2712_v40 }
  0x41   :  { %2147 = vmatprep.subr.bf16.mxu0 %v2146_v41  ;;  %2172 = vmatprep.subr.bf16.mxu1 %v2607_v0 }
  0x44   :  { %2149 = vmatpush3.bf16.msra.mxu0 %v2146_v41  ;;  %2174 = vmatpush3.bf16.msra.mxu1 %v2716_v46 }
  0x45   :  { %2151 = vmatprep.subr.bf16.mxu0 %v2150_v47  ;;  %2175 = vmatprep.subr.bf16.mxu1 %v2607_v0 }
  0x48   :  { %2153 = vmatpush3.bf16.msra.mxu0 %v2150_v47  ;;  %2177 = vmatpush3.bf16.msra.mxu1 %v2720_v50 }
  0x49   :  { %2178 = vmatprep.subr.bf16.mxu0 %v2607_v0  ;;  %2202 = vmatprep.subr.bf16.mxu1 %v2607_v0 }
  0x4b   :  { %1635 = vmatmul.mubr.f32.vlgmr.msra.gmra.mrb[0].mxu0 %v59_v51  ;;  %1685 = vmatmul.mubr.f32.vlgmr.msra.gmra.mrb[0].mxu1 %v246_v52 }
  0x4c   :  { %2180 = vmatpush3.bf16.msra.mxu0 %v2690_v9  ;;  %1637 = vmatprep.mubr.f32.mxu0 %v60_v53 }
  0x4d   :  { %2181 = vmatprep.subr.bf16.mxu0 %v2607_v0  ;;  %2204 = vmatpush3.bf16.msra.mxu1 %v2690_v9 }
  0x4e   :  { %2205 = vmatprep.subr.bf16.mxu1 %v2607_v0  ;;  %1754 = vmatprep.mubr.msk.f32.mxu1 %vm2608_vm0, %v2609_v1 }
  0x4f   :  { %1638 = vmatmul.mubr.f32.gmra.mrb[2].mxu0 %v61_v54 }
  0x50   :  { %2183 = vmatpush3.bf16.msra.mxu0 %v2693_v15  ;;  %1640 = vmatprep.mubr.f32.mxu0 %v62_v55 }
  0x51   :  { %2184 = vmatprep.subr.bf16.mxu0 %v2607_v0  ;;  %2207 = vmatpush3.bf16.msra.mxu1 %v2693_v15 }
  0x52   :  { %2208 = vmatprep.subr.bf16.mxu1 %v2607_v0 }
  0x53   :  { %1641 = vmatmul.mubr.f32.gmra.mrb[4].mxu0 %v63_v56 }
  0x54   :  { %2186 = vmatpush3.bf16.msra.mxu0 %v2697_v21  ;;  %1643 = vmatprep.mubr.f32.mxu0 %v64_v57 }
  0x55   :  { %2187 = vmatprep.subr.bf16.mxu0 %v2607_v0  ;;  %2210 = vmatpush3.bf16.msra.mxu1 %v2697_v21 }
  0x56   :  { %2211 = vmatprep.subr.bf16.mxu1 %v2607_v0 }
  0x57   :  { %1644 = vmatmul.mubr.f32.gmra.mrb[6].mxu0 %v65_v58 }
  0x58   :  { %2189 = vmatpush3.bf16.msra.mxu0 %v2704_v28  ;;  %1646 = vmatprep.mubr.f32.mxu0 %v66_v59 }
  0x59   :  { %2190 = vmatprep.subr.bf16.mxu0 %v2607_v0  ;;  %2213 = vmatpush3.bf16.msra.mxu1 %v2704_v28 }
  0x5a   :  { %2214 = vmatprep.subr.bf16.mxu1 %v2607_v0 }
  0x5b   :  { %1647 = vmatmul.mubr.f32.gmra.mrb[8].mxu0 %v67_v60 }
  0x5c   :  { %2192 = vmatpush3.bf16.msra.mxu0 %v2708_v34  ;;  %1649 = vmatprep.mubr.f32.mxu0 %v68_v61 }
  0x5d   :  { %2193 = vmatprep.subr.bf16.mxu0 %v2607_v0  ;;  %2216 = vmatpush3.bf16.msra.mxu1 %v2708_v34 }
  0x5e   :  { %2217 = vmatprep.subr.bf16.mxu1 %v2607_v0 }
  0x5f   :  { %1650 = vmatmul.mubr.f32.gmra.mrb[10].mxu0 %v69_v62 }
  0x60   :  { %2195 = vmatpush3.bf16.msra.mxu0 %v2712_v40  ;;  %1719 = vmatprep.mubr.msk.f32.mxu0 %vm2608_vm0, %v2609_v1 }
  0x61   :  { %2196 = vmatprep.subr.bf16.mxu0 %v2607_v0  ;;  %2219 = vmatpush3.bf16.msra.mxu1 %v2712_v40 }
  0x62   :  { %2220 = vmatprep.subr.bf16.mxu1 %v2607_v0 }
  0x64   :  { %2198 = vmatpush3.bf16.msra.mxu0 %v2716_v46 }
  0x65   :  { %2199 = vmatprep.subr.bf16.mxu0 %v2607_v0  ;;  %2222 = vmatpush3.bf16.msra.mxu1 %v2716_v46 }
  0x66   :  { %2223 = vmatprep.subr.bf16.mxu1 %v2607_v0 }
  0x68   :  { %2201 = vmatpush3.bf16.msra.mxu0 %v2720_v50 }
  0x69   :  { %2225 = vmatpush3.bf16.msra.mxu1 %v2720_v50  ;;  %2226 = vmatprep.subr.bf16.mxu0 %v2607_v0 }
  0x6a   :  { %2250 = vmatprep.subr.bf16.mxu1 %v2607_v0 }
 0x11e   :  { %v1636_v2 = vpop.f32.mrb[0].mxu0  ;;  %v314_v3 = vpop.f32.mrb[0].mxu1 }
 0x11f   :  { %v159_v4 = vpop.f32.mrb[1].mxu0  ;;  %v1686_v5 = vpop.f32.mrb[1].mxu1  ;;  %v165_v22 = vadd.f32 %v1636_v2, %v2801_v63 }
 0x120   :  { %v160_v6 = vadd.f32 %v2801_v63, %v159_v4 }
 0x122   :  { %v318_v7 = vadd.f32 %v314_v3, %v160_v6  ;;  %v2804_v8 = vpop.f32.mrb[2].mxu0 }
 0x123   :  { %v169_v10 = vpop.f32.mrb[3].mxu0  ;;  %v175_v33 = vadd.f32 %v2804_v8, %v2801_v63  ;;  %v1153_v8 = vld [vmem:[%s3121_s5 + $0x28] sm:$0xff] }
 0x124   :  { %2483 = vtanh.f32 %v318_v7  ;;  %v170_v27 = vadd.f32 %v2801_v63, %v169_v10  ;;  %v1152_v7 = vld [vmem:[%s3121_s5 + $0x20] sm:$0xff] }
 0x125   :  { %v2450_v10 = vpack.c.bf16 %v1153_v8, %v1152_v7 }
 0x126   :  { %v2827_v12 = vpop.f32.mrb[4].mxu0 }
 0x127   :  { %v2829_v13 = vpop.f32.mrb[5].mxu0  ;;  %v185_v45 = vadd.f32 %v2827_v12, %v2801_v63  ;;  %v1154_v12 = vld [vmem:[%s3121_s5 + $0x30] sm:$0xff] }
 0x128   :  { %v180_v39 = vadd.f32 %v2801_v63, %v2829_v13  ;;  %v1155_v13 = vld [vmem:[%s3121_s5 + $0x38] sm:$0xff] }
 0x12a   :  { %v2831_v14 = vpop.f32.mrb[6].mxu0 }
 0x12b   :  { %v2833_v16 = vpop.f32.mrb[7].mxu0  ;;  %v195_v57 = vadd.f32 %v2831_v14, %v2801_v63  ;;  %v2454_v14 = vpack.c.bf16 %v1155_v13, %v1154_v12 }
 0x12c   :  { %v190_v52 = vadd.f32 %v2801_v63, %v2833_v16  ;;  %v1156_v16 = vld [vmem:[%s3121_s5 + $0x40] sm:$0xff] }
 0x12e   :  { %v2806_v11 = vpop.eup %2483  ;;  %v2835_v17 = vpop.f32.mrb[8].mxu0 }
 0x12f   :  { %1720 = vmatmul.mubr.f32.vlgmr.msra.gmra.mrb[12].mxu0 %v2806_v11  ;;  %v2837_v18 = vpop.f32.mrb[9].mxu0 }
 0x130   :  { %2228 = vmatpush3.bf16.msra.mxu0 %v2690_v9  ;;  %1789 = vmatprep.mubr.msk.f32.mxu0 %vm2608_vm0, %v2609_v1  ;;  %v200_v62 = vadd.f32 %v2801_v63, %v2837_v18  ;;  %v1158_v18 = vld [vmem:[%s3121_s5 + $0x50] sm:$0xff] }
 0x131   :  { %2229 = vmatprep.subr.bf16.mxu0 %v2607_v0 }
 0x132   :  { %v2839_v19 = vpop.f32.mrb[10].mxu0 }
 0x133   :  { %v2841_v20 = vpop.f32.mrb[11].mxu0 }
 0x134   :  { %2231 = vmatpush3.bf16.msra.mxu0 %v2693_v15 }
 0x135   :  { %2232 = vmatprep.subr.bf16.mxu0 %v2607_v0 }
 0x138   :  { %2234 = vmatpush3.bf16.msra.mxu0 %v2697_v21 }
 0x139   :  { %2235 = vmatprep.subr.bf16.mxu0 %v2607_v0 }
 0x13c   :  { %2237 = vmatpush3.bf16.msra.mxu0 %v2704_v28 }
 0x13d   :  { %2238 = vmatprep.subr.bf16.mxu0 %v2607_v0 }
 0x140   :  { %2240 = vmatpush3.bf16.msra.mxu0 %v2708_v34 }
 0x141   :  { %2241 = vmatprep.subr.bf16.mxu0 %v2607_v0 }
 0x144   :  { %2243 = vmatpush3.bf16.msra.mxu0 %v2712_v40 }
 0x145   :  { %2244 = vmatprep.subr.bf16.mxu0 %v2607_v0 }
 0x148   :  { %2246 = vmatpush3.bf16.msra.mxu0 %v2716_v46 }
 0x149   :  { %2247 = vmatprep.subr.bf16.mxu0 %v2607_v0 }
 0x14c   :  { %2249 = vmatpush3.bf16.msra.mxu0 %v2720_v50 }
 0x14d   :  { %2274 = vmatprep.subr.bf16.mxu0 %v2607_v0 }
 0x202   :  { %v388_v23 = vpop.f32.mrb[12].mxu0 }
 0x203   :  { %v392_v24 = vadd.f32 %v388_v23, %v165_v22  ;;  %v1721_v25 = vpop.f32.mrb[13].mxu0  ;;  %v1159_v22 = vld [vmem:[%s3121_s5 + $0x58] sm:$0xff] }
 0x204   :  { %v2462_v23 = vpack.c.bf16 %v1159_v22, %v1158_v18  ;;  %v1161_v25 = vld [vmem:[%s3121_s5 + $0x68] sm:$0xff] }
 0x205   :  { %2485 = vtanh.f32 %v392_v24  ;;  %v1160_v24 = vld [vmem:[%s3121_s5 + $0x60] sm:$0xff] }
 0x20f   :  { %v2844_v26 = vpop.eup %2485 }
 0x210   :  { %1755 = vmatmul.mubr.f32.vlgmr.msra.gmra.mrb[2].mxu1 %v2844_v26 }
 0x211   :  { %2252 = vmatpush3.bf16.msra.mxu1 %v2690_v9  ;;  %1824 = vmatprep.mubr.msk.f32.mxu1 %vm2608_vm0, %v2609_v1 }
 0x212   :  { %2253 = vmatprep.subr.bf16.mxu1 %v2607_v0 }
 0x215   :  { %2255 = vmatpush3.bf16.msra.mxu1 %v2693_v15 }
 0x216   :  { %2256 = vmatprep.subr.bf16.mxu1 %v2607_v0 }
 0x219   :  { %2258 = vmatpush3.bf16.msra.mxu1 %v2697_v21 }
 0x21a   :  { %2259 = vmatprep.subr.bf16.mxu1 %v2607_v0 }
 0x21d   :  { %2261 = vmatpush3.bf16.msra.mxu1 %v2704_v28 }
 0x21e   :  { %2262 = vmatprep.subr.bf16.mxu1 %v2607_v0 }
 0x221   :  { %2264 = vmatpush3.bf16.msra.mxu1 %v2708_v34 }
 0x222   :  { %2265 = vmatprep.subr.bf16.mxu1 %v2607_v0 }
 0x225   :  { %2267 = vmatpush3.bf16.msra.mxu1 %v2712_v40 }
 0x226   :  { %2268 = vmatprep.subr.bf16.mxu1 %v2607_v0 }
 0x229   :  { %2270 = vmatpush3.bf16.msra.mxu1 %v2716_v46 }
 0x22a   :  { %2271 = vmatprep.subr.bf16.mxu1 %v2607_v0 }
 0x22d   :  { %2273 = vmatpush3.bf16.msra.mxu1 %v2720_v50 }
 0x22e   :  { %2298 = vmatprep.subr.bf16.mxu1 %v2607_v0 }
 0x2e3   :  { %v462_v29 = vpop.f32.mrb[2].mxu1 }
 0x2e4   :  { %v466_v30 = vadd.f32 %v462_v29, %v170_v27  ;;  %v1756_v31 = vpop.f32.mrb[3].mxu1  ;;  %v2466_v27 = vpack.c.bf16 %v1161_v25, %v1160_v24  ;;  %v1162_v29 = vld [vmem:[%s3121_s5 + $0x70] sm:$0xff] }
 0x2e6   :  { %2487 = vtanh.f32 %v466_v30  ;;  %v1163_v30 = vld [vmem:[%s3121_s5 + $0x78] sm:$0xff] }
 0x2e7   :  { %v2470_v31 = vpack.c.bf16 %v1163_v30, %v1162_v29 }
 0x2f0   :  { %v2866_v32 = vpop.eup %2487 }
 0x2f1   :  { %1790 = vmatmul.mubr.f32.vlgmr.msra.gmra.mrb[14].mxu0 %v2866_v32 }
 0x2f2   :  { %2276 = vmatpush3.bf16.msra.mxu0 %v2690_v9  ;;  %1859 = vmatprep.mubr.msk.f32.mxu0 %vm2608_vm0, %v2609_v1 }
 0x2f3   :  { %2277 = vmatprep.subr.bf16.mxu0 %v2607_v0 }
 0x2f6   :  { %2279 = vmatpush3.bf16.msra.mxu0 %v2693_v15 }
 0x2f7   :  { %2280 = vmatprep.subr.bf16.mxu0 %v2607_v0 }
 0x2fa   :  { %2282 = vmatpush3.bf16.msra.mxu0 %v2697_v21 }
 0x2fb   :  { %2283 = vmatprep.subr.bf16.mxu0 %v2607_v0 }
 0x2fe   :  { %2285 = vmatpush3.bf16.msra.mxu0 %v2704_v28 }
 0x2ff   :  { %2286 = vmatprep.subr.bf16.mxu0 %v2607_v0 }
 0x302   :  { %2288 = vmatpush3.bf16.msra.mxu0 %v2708_v34 }
 0x303   :  { %2289 = vmatprep.subr.bf16.mxu0 %v2607_v0 }
 0x306   :  { %2291 = vmatpush3.bf16.msra.mxu0 %v2712_v40 }
 0x307   :  { %2292 = vmatprep.subr.bf16.mxu0 %v2607_v0 }
 0x30a   :  { %2294 = vmatpush3.bf16.msra.mxu0 %v2716_v46 }
 0x30b   :  { %2295 = vmatprep.subr.bf16.mxu0 %v2607_v0 }
 0x30e   :  { %2297 = vmatpush3.bf16.msra.mxu0 %v2720_v50 }
 0x30f   :  { %2322 = vmatprep.subr.bf16.mxu0 %v2607_v0 }
 0x3c4   :  { %v536_v35 = vpop.f32.mrb[14].mxu0 }
 0x3c5   :  { %v540_v36 = vadd.f32 %v536_v35, %v175_v33  ;;  %v1791_v37 = vpop.f32.mrb[15].mxu0  ;;  %v210_v33 = vadd.f32 %v2801_v63, %v2841_v20 }
 0x3c6   :  { %v1341_v37 = vld [vmem:[%s3122_s6] ss:$0 sm:$0xff]  ;;  %s2610_s6 = smov [#allocation9]  }
 0x3c7   :  { %2489 = vtanh.f32 %v540_v36  ;;  %s1326_s19 = sshll.u32 %s2610_s6, 4  ;;  %s1327_s19 = int_to_ptr.vmem [resolvable:$true] %s1326_s19 }
 0x3c8   :  { %s2551_s20 = scalar_lea.vmem %s1327_s19, 128  ;;  %p2556_p3 = scmp.lt.s32.totalorder %s1327_s19, %s1327_s19 }
 0x3c9   :  { %p2552_p2 = scmp.ne.s32.totalorder %s1327_s19, %s2551_s20  ;;  %p2557_p4 = scmp.lt.s32.totalorder %s2551_s20, %s2551_s20 }
 0x3cb   :  { %p2558_p5 = por %p2557_p4, %p2556_p3 }
 0x3cd   :  { %p2559_p6 = pnand %p2558_p5, %p2552_p2 }
 0x3d1   :  { %v2889_v38 = vpop.eup %2489 }
 0x3d2   :  { %1825 = vmatmul.mubr.f32.vlgmr.msra.gmra.mrb[4].mxu1 %v2889_v38 }
 0x3d3   :  { %2300 = vmatpush3.bf16.msra.mxu1 %v2690_v9  ;;  %1894 = vmatprep.mubr.msk.f32.mxu1 %vm2608_vm0, %v2609_v1 }
 0x3d4   :  { %2301 = vmatprep.subr.bf16.mxu1 %v2607_v0 }
 0x3d7   :  { %2303 = vmatpush3.bf16.msra.mxu1 %v2693_v15 }
 0x3d8   :  { %2304 = vmatprep.subr.bf16.mxu1 %v2607_v0 }
 0x3db   :  { %2306 = vmatpush3.bf16.msra.mxu1 %v2697_v21 }
 0x3dc   :  { %2307 = vmatprep.subr.bf16.mxu1 %v2607_v0 }
 0x3df   :  { %2309 = vmatpush3.bf16.msra.mxu1 %v2704_v28 }
 0x3e0   :  { %2310 = vmatprep.subr.bf16.mxu1 %v2607_v0 }
 0x3e3   :  { %2312 = vmatpush3.bf16.msra.mxu1 %v2708_v34 }
 0x3e4   :  { %2313 = vmatprep.subr.bf16.mxu1 %v2607_v0 }
 0x3e7   :  { %2315 = vmatpush3.bf16.msra.mxu1 %v2712_v40 }
 0x3e8   :  { %2316 = vmatprep.subr.bf16.mxu1 %v2607_v0 }
 0x3eb   :  { %2318 = vmatpush3.bf16.msra.mxu1 %v2716_v46 }
 0x3ec   :  { %2319 = vmatprep.subr.bf16.mxu1 %v2607_v0 }
 0x3ef   :  { %2321 = vmatpush3.bf16.msra.mxu1 %v2720_v50 }
 0x3f0   :  { %2346 = vmatprep.subr.bf16.mxu1 %v2607_v0 }
 0x4a5   :  { %v610_v41 = vpop.f32.mrb[4].mxu1 }
 0x4a6   :  { %v614_v42 = vadd.f32 %v610_v41, %v180_v39  ;;  %v1826_v43 = vpop.f32.mrb[5].mxu1 }
 0x4a8   :  { %2491 = vtanh.f32 %v614_v42 }
 0x4b2   :  { %v2912_v44 = vpop.eup %2491 }
 0x4b3   :  { %1860 = vmatmul.mubr.f32.vlgmr.msra.gmra.mrb[16].mxu0 %v2912_v44 }
 0x4b4   :  { %2324 = vmatpush3.bf16.msra.mxu0 %v2690_v9  ;;  %1929 = vmatprep.mubr.msk.f32.mxu0 %vm2608_vm0, %v2609_v1 }
 0x4b5   :  { %2325 = vmatprep.subr.bf16.mxu0 %v2607_v0 }
 0x4b8   :  { %2327 = vmatpush3.bf16.msra.mxu0 %v2693_v15 }
 0x4b9   :  { %2328 = vmatprep.subr.bf16.mxu0 %v2607_v0 }
 0x4bc   :  { %2330 = vmatpush3.bf16.msra.mxu0 %v2697_v21 }
 0x4bd   :  { %2331 = vmatprep.subr.bf16.mxu0 %v2607_v0 }
 0x4c0   :  { %2333 = vmatpush3.bf16.msra.mxu0 %v2704_v28 }
 0x4c1   :  { %2334 = vmatprep.subr.bf16.mxu0 %v2607_v0 }
 0x4c4   :  { %2336 = vmatpush3.bf16.msra.mxu0 %v2708_v34 }
 0x4c5   :  { %2337 = vmatprep.subr.bf16.mxu0 %v2607_v0 }
 0x4c8   :  { %2339 = vmatpush3.bf16.msra.mxu0 %v2712_v40 }
 0x4c9   :  { %2340 = vmatprep.subr.bf16.mxu0 %v2607_v0 }
 0x4cc   :  { %2342 = vmatpush3.bf16.msra.mxu0 %v2716_v46 }
 0x4cd   :  { %2343 = vmatprep.subr.bf16.mxu0 %v2607_v0 }
 0x4d0   :  { %2345 = vmatpush3.bf16.msra.mxu0 %v2720_v50 }
 0x4d1   :  { %2370 = vmatprep.subr.bf16.mxu0 %v2607_v0 }
 0x586   :  { %v684_v47 = vpop.f32.mrb[16].mxu0 }
 0x587   :  { %v688_v48 = vadd.f32 %v684_v47, %v185_v45  ;;  %v1861_v49 = vpop.f32.mrb[17].mxu0 }
 0x589   :  { %2493 = vtanh.f32 %v688_v48 }
 0x593   :  { %v2935_v51 = vpop.eup %2493 }
 0x594   :  { %1895 = vmatmul.mubr.f32.vlgmr.msra.gmra.mrb[6].mxu1 %v2935_v51 }
 0x595   :  { %2348 = vmatpush3.bf16.msra.mxu1 %v2690_v9  ;;  %1964 = vmatprep.mubr.msk.f32.mxu1 %vm2608_vm0, %v2609_v1 }
 0x596   :  { %2349 = vmatprep.subr.bf16.mxu1 %v2607_v0 }
 0x599   :  { %2351 = vmatpush3.bf16.msra.mxu1 %v2693_v15 }
 0x59a   :  { %2352 = vmatprep.subr.bf16.mxu1 %v2607_v0 }
 0x59d   :  { %2354 = vmatpush3.bf16.msra.mxu1 %v2697_v21 }
 0x59e   :  { %2355 = vmatprep.subr.bf16.mxu1 %v2607_v0 }
 0x5a1   :  { %2357 = vmatpush3.bf16.msra.mxu1 %v2704_v28 }
 0x5a2   :  { %2358 = vmatprep.subr.bf16.mxu1 %v2607_v0 }
 0x5a5   :  { %2360 = vmatpush3.bf16.msra.mxu1 %v2708_v34 }
 0x5a6   :  { %2361 = vmatprep.subr.bf16.mxu1 %v2607_v0 }
 0x5a9   :  { %2363 = vmatpush3.bf16.msra.mxu1 %v2712_v40 }
 0x5aa   :  { %2364 = vmatprep.subr.bf16.mxu1 %v2607_v0 }
 0x5ad   :  { %2366 = vmatpush3.bf16.msra.mxu1 %v2716_v46 }
 0x5ae   :  { %2367 = vmatprep.subr.bf16.mxu1 %v2607_v0 }
 0x5b1   :  { %2369 = vmatpush3.bf16.msra.mxu1 %v2720_v50 }
 0x5b2   :  { %2394 = vmatprep.subr.bf16.mxu1 %v2607_v0 }
 0x667   :  { %v758_v53 = vpop.f32.mrb[6].mxu1 }
 0x668   :  { %v762_v54 = vadd.f32 %v758_v53, %v190_v52  ;;  %v1896_v55 = vpop.f32.mrb[7].mxu1 }
 0x66a   :  { %2495 = vtanh.f32 %v762_v54 }
 0x674   :  { %v2958_v56 = vpop.eup %2495 }
 0x675   :  { %1930 = vmatmul.mubr.f32.vlgmr.msra.gmra.mrb[18].mxu0 %v2958_v56 }
 0x676   :  { %2372 = vmatpush3.bf16.msra.mxu0 %v2690_v9  ;;  %1999 = vmatprep.mubr.msk.f32.mxu0 %vm2608_vm0, %v2609_v1 }
 0x677   :  { %2373 = vmatprep.subr.bf16.mxu0 %v2607_v0 }
 0x67a   :  { %2375 = vmatpush3.bf16.msra.mxu0 %v2693_v15 }
 0x67b   :  { %2376 = vmatprep.subr.bf16.mxu0 %v2607_v0 }
 0x67e   :  { %2378 = vmatpush3.bf16.msra.mxu0 %v2697_v21 }
 0x67f   :  { %2379 = vmatprep.subr.bf16.mxu0 %v2607_v0 }
 0x682   :  { %2381 = vmatpush3.bf16.msra.mxu0 %v2704_v28 }
 0x683   :  { %2382 = vmatprep.subr.bf16.mxu0 %v2607_v0 }
 0x686   :  { %2384 = vmatpush3.bf16.msra.mxu0 %v2708_v34 }
 0x687   :  { %2385 = vmatprep.subr.bf16.mxu0 %v2607_v0 }
 0x68a   :  { %2387 = vmatpush3.bf16.msra.mxu0 %v2712_v40 }
 0x68b   :  { %2388 = vmatprep.subr.bf16.mxu0 %v2607_v0 }
 0x68e   :  { %2390 = vmatpush3.bf16.msra.mxu0 %v2716_v46 }
 0x68f   :  { %2391 = vmatprep.subr.bf16.mxu0 %v2607_v0 }
 0x692   :  { %2393 = vmatpush3.bf16.msra.mxu0 %v2720_v50 }
 0x693   :  { %2418 = vmatprep.subr.bf16.mxu0 %v2607_v0 }
 0x748   :  { %v832_v58 = vpop.f32.mrb[18].mxu0 }
 0x749   :  { %v836_v59 = vadd.f32 %v832_v58, %v195_v57  ;;  %v1931_v60 = vpop.f32.mrb[19].mxu0 }
 0x74a   :  { %v215_v60 = vadd.f32 %v2839_v19, %v2801_v63 }
 0x74b   :  { %2497 = vtanh.f32 %v836_v59 }
 0x755   :  { %v2981_v61 = vpop.eup %2497 }
 0x756   :  { %1965 = vmatmul.mubr.f32.vlgmr.msra.gmra.mrb[8].mxu1 %v2981_v61 }
 0x757   :  { %2396 = vmatpush3.bf16.msra.mxu1 %v2690_v9  ;;  %2034 = vmatprep.mubr.msk.f32.mxu1 %vm2608_vm0, %v2609_v1 }
 0x758   :  { %2397 = vmatprep.subr.bf16.mxu1 %v2607_v0 }
 0x75b   :  { %2399 = vmatpush3.bf16.msra.mxu1 %v2693_v15 }
 0x75c   :  { %2400 = vmatprep.subr.bf16.mxu1 %v2607_v0 }
 0x75f   :  { %2402 = vmatpush3.bf16.msra.mxu1 %v2697_v21 }
 0x760   :  { %2403 = vmatprep.subr.bf16.mxu1 %v2607_v0 }
 0x763   :  { %2405 = vmatpush3.bf16.msra.mxu1 %v2704_v28 }
 0x764   :  { %2406 = vmatprep.subr.bf16.mxu1 %v2607_v0 }
 0x767   :  { %2408 = vmatpush3.bf16.msra.mxu1 %v2708_v34 }
 0x768   :  { %2409 = vmatprep.subr.bf16.mxu1 %v2607_v0 }
 0x76b   :  { %2411 = vmatpush3.bf16.msra.mxu1 %v2712_v40 }
 0x76c   :  { %2412 = vmatprep.subr.bf16.mxu1 %v2607_v0 }
 0x76f   :  { %2414 = vmatpush3.bf16.msra.mxu1 %v2716_v46 }
 0x770   :  { %2415 = vmatprep.subr.bf16.mxu1 %v2607_v0 }
 0x773   :  { %2417 = vmatpush3.bf16.msra.mxu1 %v2720_v50 }
 0x829   :  { %v906_v2 = vpop.f32.mrb[8].mxu1 }
 0x82a   :  { %v910_v3 = vadd.f32 %v906_v2, %v200_v62  ;;  %v1966_v4 = vpop.f32.mrb[9].mxu1 }
 0x82c   :  { %2499 = vtanh.f32 %v910_v3 }
 0x836   :  { %v3003_v5 = vpop.eup %2499 }
 0x837   :  { %2000 = vmatmul.mubr.f32.vlgmr.msra.gmra.mrb[20].mxu0 %v3003_v5 }
 0x838   :  { %2420 = vmatpush3.bf16.msra.mxu0 %v2690_v9  ;;  %2069 = vmatprep.mubr.msk.f32.mxu0 %vm2608_vm0, %v2609_v1  ;;  %v1148_v1 = vld [vmem:[%s3121_s5] sm:$0xff]  ;;  %v1149_v9 = vld [vmem:[%s3121_s5 + $0x8] sm:$0xff] }
 0x839   :  { %2421 = vmatprep.subr.bf16.mxu0 %v2607_v0 }
 0x83c   :  { %2423 = vmatpush3.bf16.msra.mxu0 %v2693_v15  ;;  %v2442_v15 = vpack.c.bf16 %v1149_v9, %v1148_v1 }
 0x83d   :  { %2424 = vmatprep.subr.bf16.mxu0 %v2607_v0 }
 0x83e   :  { %2443 = vmatprep.subr.bf16.mxu1 %v2442_v15 }
 0x840   :  { %2426 = vmatpush3.bf16.msra.mxu0 %v2697_v21  ;;  %v205_v21 = vadd.f32 %v2835_v17, %v2801_v63 }
 0x841   :  { %2427 = vmatprep.subr.bf16.mxu0 %v2607_v0 }
 0x844   :  { %2429 = vmatpush3.bf16.msra.mxu0 %v2704_v28 }
 0x845   :  { %2430 = vmatprep.subr.bf16.mxu0 %v2607_v0 }
 0x848   :  { %2432 = vmatpush3.bf16.msra.mxu0 %v2708_v34 }
 0x849   :  { %2433 = vmatprep.subr.bf16.mxu0 %v2607_v0 }
 0x84c   :  { %2435 = vmatpush3.bf16.msra.mxu0 %v2712_v40 }
 0x84d   :  { %2436 = vmatprep.subr.bf16.mxu0 %v2607_v0 }
 0x850   :  { %2438 = vmatpush3.bf16.msra.mxu0 %v2716_v46  ;;  %v1151_v46 = vld [vmem:[%s3121_s5 + $0x18] sm:$0xff] }
 0x851   :  { %2439 = vmatprep.subr.bf16.mxu0 %v2607_v0  ;;  %v1150_v0 = vld [vmem:[%s3121_s5 + $0x10] sm:$0xff] }
 0x854   :  { %2441 = vmatpush3.bf16.msra.mxu0 %v2720_v50  ;;  %v2446_v50 = vpack.c.bf16 %v1151_v46, %v1150_v0 }
 0x90a   :  { %v980_v28 = vpop.f32.mrb[20].mxu0 }
 0x90b   :  { %v984_v34 = vadd.f32 %v980_v28, %v205_v21  ;;  %v2001_v40 = vpop.f32.mrb[21].mxu0 }
 0x90d   :  { %2501 = vtanh.f32 %v984_v34 }
 0x917   :  { %v2502_v6 = vpop.eup %2501 }
 0x918   :  { %2035 = vmatmul.mubr.f32.vlgmr.msra.gmra.mrb[10].mxu1 %v2502_v6 }
 0x919   :  { %2445 = vmatpush3.bf16.msra.mxu1 %v2442_v15  ;;  %2104 = vmatprep.mubr.f32.mxu1 %v2806_v11  ;;  %v1157_v11 = vld [vmem:[%s3121_s5 + $0x48] sm:$0xff] }
 0x91a   :  { %2447 = vmatprep.subr.bf16.mxu1 %v2446_v50  ;;  %v2458_v17 = vpack.c.bf16 %v1157_v11, %v1156_v16 }
 0x91d   :  { %2449 = vmatpush3.bf16.msra.mxu1 %v2446_v50 }
 0x91e   :  { %2451 = vmatprep.subr.bf16.mxu1 %v2450_v10 }
 0x921   :  { %2453 = vmatpush3.bf16.msra.mxu1 %v2450_v10 }
 0x922   :  { %2455 = vmatprep.subr.bf16.mxu1 %v2454_v14 }
 0x925   :  { %2457 = vmatpush3.bf16.msra.mxu1 %v2454_v14 }
 0x926   :  { %2459 = vmatprep.subr.bf16.mxu1 %v2458_v17 }
 0x929   :  { %2461 = vmatpush3.bf16.msra.mxu1 %v2458_v17 }
 0x92a   :  { %2463 = vmatprep.subr.bf16.mxu1 %v2462_v23 }
 0x92d   :  { %2465 = vmatpush3.bf16.msra.mxu1 %v2462_v23 }
 0x92e   :  { %2467 = vmatprep.subr.bf16.mxu1 %v2466_v27 }
 0x931   :  { %2469 = vmatpush3.bf16.msra.mxu1 %v2466_v27 }
 0x932   :  { %2471 = vmatprep.subr.bf16.mxu1 %v2470_v31 }
 0x935   :  { %2473 = vmatpush3.bf16.msra.mxu1 %v2470_v31 }
 0x938   :  { %2105 = vmatmul.mubr.f32.vlgmr.msra.gmra.mrb[12].mxu1 %v2844_v26 }
 0x939   :  { %2107 = vmatprep.mubr.f32.mxu1 %v2866_v32 }
 0x93c   :  { %2108 = vmatmul.mubr.f32.gmra.mrb[14].mxu1 %v2889_v38 }
 0x93d   :  { %2110 = vmatprep.mubr.f32.mxu1 %v2912_v44 }
 0x940   :  { %2111 = vmatmul.mubr.f32.gmra.mrb[16].mxu1 %v2935_v51 }
 0x941   :  { %2113 = vmatprep.mubr.f32.mxu1 %v2958_v56 }
 0x944   :  { %2114 = vmatmul.mubr.f32.gmra.mrb[18].mxu1 %v2981_v61 }
 0x945   :  { %2116 = vmatprep.mubr.f32.mxu1 %v3003_v5 }
 0x948   :  { %2117 = vmatmul.mubr.f32.gmra.mrb[20].mxu1 %v2502_v6 }
 0x9eb   :  { %v1054_v35 = vpop.f32.mrb[10].mxu1 }
 0x9ec   :  { %v1058_v26 = vadd.f32 %v1054_v35, %v210_v33  ;;  %v2036_v36 = vpop.f32.mrb[11].mxu1 }
 0x9ee   :  { %2503 = vtanh.f32 %v1058_v26 }
 0x9f8   :  { %v2504_v32 = vpop.eup %2503 }
 0x9f9   :  { %2070 = vmatmul.mubr.f32.vlgmr.msra.gmra.mrb[22].mxu0 %v2504_v32  ;;  %2119 = vmatprep.mubr.f32.mxu1 %v2504_v32 }
 0xa0b   :  { %v2106_v38 = vpop.f32.mrb[12].mxu1 }
 0xa0c   :  { %v1243_v39 = vadd.f32 %v2106_v38, %v1341_v37  ;;  %v1237_v41 = vpop.f32.mrb[13].mxu1 }
 0xa0d   :  { %v1238_v42 = vadd.f32 %v1341_v37, %v1237_v41 }
 0xa0e   :  { %1297 = vst [vmem:[#allocation8 + $0x8] sm:$0xff] %v1243_v39 }
 0xa0f   :  { %1296 = vst [vmem:[#allocation8] sm:$0xff] %v1238_v42  ;;  %v2109_v43 = vpop.f32.mrb[14].mxu1 }
 0xa10   :  { %v1253_v44 = vadd.f32 %v2109_v43, %v1341_v37  ;;  %v1247_v20 = vpop.f32.mrb[15].mxu1 }
 0xa11   :  { %v1248_v45 = vadd.f32 %v1341_v37, %v1247_v20 }
 0xa12   :  { %1299 = vst [vmem:[#allocation8 + $0x18] sm:$0xff] %v1253_v44 }
 0xa13   :  { %1298 = vst [vmem:[#allocation8 + $0x10] sm:$0xff] %v1248_v45  ;;  %v2112_v47 = vpop.f32.mrb[16].mxu1 }
 0xa14   :  { %v1263_v48 = vadd.f32 %v2112_v47, %v1341_v37  ;;  %v1257_v49 = vpop.f32.mrb[17].mxu1 }
 0xa15   :  { %v1258_v51 = vadd.f32 %v1341_v37, %v1257_v49 }
 0xa16   :  { %1301 = vst [vmem:[#allocation8 + $0x28] sm:$0xff] %v1263_v48 }
 0xa17   :  { %1300 = vst [vmem:[#allocation8 + $0x20] sm:$0xff] %v1258_v51  ;;  %v2115_v52 = vpop.f32.mrb[18].mxu1 }
 0xa18   :  { %v1273_v53 = vadd.f32 %v2115_v52, %v1341_v37  ;;  %v1267_v54 = vpop.f32.mrb[19].mxu1 }
 0xa19   :  { %v1268_v55 = vadd.f32 %v1341_v37, %v1267_v54 }
 0xa1a   :  { %1303 = vst [vmem:[#allocation8 + $0x38] sm:$0xff] %v1273_v53 }
 0xa1b   :  { %1302 = vst [vmem:[#allocation8 + $0x30] sm:$0xff] %v1268_v55  ;;  %v2118_v56 = vpop.f32.mrb[20].mxu1 }
 0xa1c   :  { %v1283_v57 = vadd.f32 %v2118_v56, %v1341_v37  ;;  %v1277_v58 = vpop.f32.mrb[21].mxu1 }
 0xa1d   :  { %v1278_v59 = vadd.f32 %v1341_v37, %v1277_v58 }
 0xa1e   :  { %1305 = vst [vmem:[#allocation8 + $0x48] sm:$0xff] %v1283_v57 }
 0xa1f   :  { %1304 = vst [vmem:[#allocation8 + $0x40] sm:$0xff] %v1278_v59 }
 0xacc   :  { %v1128_v61 = vpop.f32.mrb[22].mxu0 }
 0xacd   :  { %v1132_v62 = vadd.f32 %v1128_v61, %v215_v60  ;;  %v2071_v2 = vpop.f32.mrb[23].mxu0 }
 0xacf   :  { %2505 = vtanh.f32 %v1132_v62 }
 0xad9   :  { %v2506_v3 = vpop.eup %2505 }
 0xada   :  { %1135 = vst [vmem:[#allocation9] sm:$0xff] %v2506_v3  ;;  %2120 = vmatmul.mubr.f32.gmra.mrb[22].mxu1 %v2506_v3 }
 0xadb   :  { %2562 = shalt.err (!%p2559_p6)
}
 0xadc   :  { %s2563_s23 = scalar_lea.hbm %s3124_s8, 128 }
 0xadd   :  { %p2564_p7 = scmp.ne.s32.totalorder %s3124_s8, %s2563_s23  ;;  %p2567_p8 = scmp.lt.u32.totalorder %s2563_s23, %s3124_s8 }
 0xadf   :  { %p2569_p9 = pnand %p2567_p8, %p2564_p7 }
 0xae1   :  { %2572 = shalt.err (!%p2569_p9)
}
 0xae2   :  { %1329 = dma.vmem_to_hbm [thread:$0]  %s1327_s19, 128, %s3124_s8, [#allocation10]  }
 0xae3   :  { %s2611_s28 = smov [#allocation8]  }
 0xae4   :  { %s1313_s3 = sshll.u32 %s2611_s28, 4  ;;  %s1314_s3 = int_to_ptr.vmem [resolvable:$true] %s1313_s3 }
 0xae5   :  { %s2573_s30 = scalar_lea.vmem %s1314_s3, 1536  ;;  %p2578_p11 = scmp.lt.s32.totalorder %s1314_s3, %s1314_s3 }
 0xae6   :  { %p2574_p10 = scmp.ne.s32.totalorder %s1314_s3, %s2573_s30  ;;  %p2579_p12 = scmp.lt.s32.totalorder %s2573_s30, %s2573_s30 }
 0xae8   :  { %p2580_p13 = por %p2579_p12, %p2578_p11 }
 0xaea   :  { %p2581_p0 = pnand %p2580_p13, %p2574_p10 }
 0xbad   :  { %v2121_v63 = vpop.f32.mrb[22].mxu1 }
 0xbae   :  { %v1293_v19 = vadd.f32 %v2121_v63, %v1341_v37  ;;  %v1287_v4 = vpop.f32.mrb[23].mxu1 }
 0xbaf   :  { %v1288_v5 = vadd.f32 %v1341_v37, %v1287_v4 }
 0xbb0   :  { %1307 = vst [vmem:[#allocation8 + $0x58] sm:$0xff] %v1293_v19 }
 0xbb1   :  { %1306 = vst [vmem:[#allocation8 + $0x50] sm:$0xff] %v1288_v5 }
 0xbb2   :  { %2584 = shalt.err (!%p2581_p0)
}
 0xbb3   :  { %s2585_s8 = scalar_lea.hbm %s3123_s7, 1536 }
 0xbb4   :  { %p2586_p1 = scmp.ne.s32.totalorder %s3123_s7, %s2585_s8  ;;  %p2589_p2 = scmp.lt.u32.totalorder %s2585_s8, %s3123_s7 }
 0xbb6   :  { %p2591_p3 = pnand %p2589_p2, %p2586_p1 }
 0xbb8   :  { %2594 = shalt.err (!%p2591_p3)
}
 0xbb9   :  { %1319 = dma.vmem_to_hbm [thread:$0]  %s1314_s3, 1536, %s3123_s7, [#allocation5], %s2604_s15, %s2604_s15, %s2605_s16  }
 0xbba   :  { %2599 = dma.done.wait [#allocation5], 1536  }
 0xbbb   :  { %2600 = vsyncadd [#allocation5], 4294965760 }
 0xbbc   :  { %2601 = dma.done.wait [#allocation10], 128  }
 0xbbd   :  { %2602 = vsyncadd [#allocation10], 4294967168 }
 0xbbe   :  { %1336 = vsyncpa [#allocation4], 1 }
 0xbbf   :  { %1337 = vsyncpa [#allocation7], 1 }
 0xbc0   :  { %1338 = vsyncpa [#allocation5], 1 }
 0xbc1   :  { %1339 = vsyncpa [#allocation10], 1 }

</bundles_post_ra>
